<compile_context>
chip_gen: v7x
topology: tpu7x:2x2x1
jax: 0.10.0
libtpu: 0.0.40
codegen_flags: <defaults>
</compile_context>

<pallas_src>
import jax
import jax.numpy as jnp
from jax.experimental import pallas as pl
from jax.experimental.pallas import tpu as pltpu


def make_actor_kernel(max_action: float):
    def actor_kernel(s_ref, w1_ref, b1_ref, w2_ref, b2_ref, w3_ref, b3_ref,
                     o_ref):
        # Layer 1: (TB, S)bf16 @ (S, 256)bf16 -> f32 acc, bias+ReLU in f32.
        h1 = jnp.dot(s_ref[...], w1_ref[...],
                     preferred_element_type=jnp.float32)
        h1 = jnp.maximum(h1 + b1_ref[...], 0.0)

        # Layer 2: (TB, 256) @ (256, 256)
        h2 = jnp.dot(h1.astype(jnp.bfloat16), w2_ref[...],
                     preferred_element_type=jnp.float32)
        h2 = jnp.maximum(h2 + b2_ref[...], 0.0)

        # Layer 3: (TB, 256) @ (256, AP) + Tanh + max_action scale (f32 epilogue).
        h3 = jnp.dot(h2.astype(jnp.bfloat16), w3_ref[...],
                     preferred_element_type=jnp.float32)
        h3 = jnp.tanh(h3 + b3_ref[...])

        o_ref[...] = (max_action * h3).astype(o_ref.dtype)

    return actor_kernel


def _round_up(x: int, m: int) -> int:
    return ((x + m - 1) // m) * m


def actor_forward(s, params, max_action, *, tb_max=256):
    """s: (B, state_dim) float32 -> (B, action_dim) float32."""
    w1, b1, w2, b2, w3, b3 = params
    B, S = s.shape
    H = w1.shape[1]
    A = w3.shape[1]

    # Lane-dense padded output width (multiple of 128).
    AP = _round_up(max(A, 128), 128)

    # Batch tile: multiple of 8, capped at tb_max (sized for v7x's 64 MiB VMEM);
    # pad batch to a multiple of the tile.
    TB = min(tb_max, _round_up(B, 8))
    B_pad = _round_up(B, TB)
    grid = (pl.cdiv(B_pad, TB),)

    # bf16 weights/states (MXU inputs); biases stay f32 for the f32 epilogue.
    s_p = jnp.zeros((B_pad, S), jnp.bfloat16).at[:B].set(s.astype(jnp.bfloat16))
    w1b = w1.astype(jnp.bfloat16)
    w2b = w2.astype(jnp.bfloat16)
    w3b = jnp.zeros((H, AP), jnp.bfloat16).at[:, :A].set(w3.astype(jnp.bfloat16))
    b1f = b1.astype(jnp.float32)
    b2f = b2.astype(jnp.float32)
    b3p = jnp.zeros((1, AP), jnp.float32).at[:, :A].set(b3.astype(jnp.float32))

    flops = 2 * B_pad * (S * H + H * H + H * AP)
    bytes_accessed = (
        s_p.size * 2 + w1b.size * 2 + w2b.size * 2 + w3b.size * 2
        + b1f.size * 4 + b2f.size * 4 + b3p.size * 4
        + B_pad * AP * 4)
    cost = pl.CostEstimate(flops=flops,
                           transcendentals=B_pad * AP,
                           bytes_accessed=bytes_accessed)

    out = pl.pallas_call(
        make_actor_kernel(float(max_action)),
        out_shape=jax.ShapeDtypeStruct((B_pad, AP), jnp.float32),
        grid=grid,
        in_specs=[
            pl.BlockSpec((TB, S), lambda i: (i, 0)),    # s    (batch-tiled)
            pl.BlockSpec((S, H), lambda i: (0, 0)),     # w1   (VMEM-resident)
            pl.BlockSpec((1, H), lambda i: (0, 0)),     # b1
            pl.BlockSpec((H, H), lambda i: (0, 0)),     # w2
            pl.BlockSpec((1, H), lambda i: (0, 0)),     # b2
            pl.BlockSpec((H, AP), lambda i: (0, 0)),    # w3   (padded to 128)
            pl.BlockSpec((1, AP), lambda i: (0, 0)),    # b3   (padded to 128)
        ],
        out_specs=pl.BlockSpec((TB, AP), lambda i: (i, 0)),
        compiler_params=pltpu.CompilerParams(
            dimension_semantics=("parallel",)),
        cost_estimate=cost,
    )(s_p, w1b, b1f, w2b, b2f, w3b, b3p)

    return out[:B, :A]


def init_actor_params(key, state_dim, action_dim, hidden=256):
    """Deterministic PyTorch-style init: U(-1/sqrt(fan_in), 1/sqrt(fan_in))."""
    ks = jax.random.split(key, 6)

    def lin(kw, kb, fan_in, fan_out):
        bound = 1.0 / jnp.sqrt(float(fan_in))
        w = jax.random.uniform(kw, (fan_in, fan_out), jnp.float32, -bound, bound)
        b = jax.random.uniform(kb, (1, fan_out), jnp.float32, -bound, bound)
        return w, b

    w1, b1 = lin(ks[0], ks[1], state_dim, hidden)
    w2, b2 = lin(ks[2], ks[3], hidden, hidden)
    w3, b3 = lin(ks[4], ks[5], hidden, action_dim)
    return (w1, b1, w2, b2, w3, b3)


def actor_reference(s, params, max_action, weight_dtype=jnp.float32):
    """Pure-JAX reference. weight_dtype=bfloat16 mirrors the kernel's precision."""
    w1, b1, w2, b2, w3, b3 = params

    def c(x):
        return x.astype(weight_dtype).astype(jnp.float32)

    h = jnp.maximum(jnp.dot(c(s), c(w1)) + b1, 0.0)
    h = jnp.maximum(jnp.dot(c(h), c(w2)) + b2, 0.0)
    return max_action * jnp.tanh(jnp.dot(c(h), c(w3)) + b3)


if __name__ == "__main__":
    key = jax.random.PRNGKey(0)
    k_param, k_state = jax.random.split(key)

    batch, state_dim, action_dim = 8, 16, 4
    max_action = 2.0

    params = init_actor_params(k_param, state_dim, action_dim)
    s = jax.random.normal(k_state, (batch, state_dim), dtype=jnp.float32)

    out = actor_forward(s, params, max_action)
    out = jax.block_until_ready(out)
    assert out.shape == (batch, action_dim), out.shape

    # Tight check vs a bf16-mirrored reference (same precision as the kernel).
    ref_bf16 = actor_reference(s, params, max_action, weight_dtype=jnp.bfloat16)
    assert jnp.allclose(out, ref_bf16, atol=2e-3, rtol=2e-3), \
        "mismatch vs bf16-mirrored reference"

    # Sanity check vs the pure-f32 reference (looser: bf16 weight rounding).
    ref_f32 = actor_reference(s, params, max_action, weight_dtype=jnp.float32)
    assert jnp.allclose(out, ref_f32, atol=5e-2, rtol=5e-2), \
        "mismatch vs f32 reference"

    print("KERNEL_OK")
</pallas_src>

<mosaic_0001>
module attributes {stable_mosaic.version = 11 : i64} {
  func.func @actor_kernel(%arg0: i32, %arg1: memref<8x16xbf16, #tpu.memory_space<vmem>>, %arg2: memref<16x256xbf16, #tpu.memory_space<vmem>>, %arg3: memref<1x256xf32, #tpu.memory_space<vmem>>, %arg4: memref<256x256xbf16, #tpu.memory_space<vmem>>, %arg5: memref<1x256xf32, #tpu.memory_space<vmem>>, %arg6: memref<256x128xbf16, #tpu.memory_space<vmem>>, %arg7: memref<1x128xf32, #tpu.memory_space<vmem>>, %arg8: memref<8x128xf32, #tpu.memory_space<vmem>>) attributes {dimension_semantics = [#tpu.dimension_semantics<parallel>], iteration_bounds = array<i64: 1>, scalar_prefetch = 0 : i64, scratch_operands = 0 : i64, tpu.core_type = #tpu.core_type<tc>, window_params = [{transform_indices = @transform_0, window_bounds = array<i64: 8, 16>}, {pipeline_mode = #tpu.pipeline_mode<synchronous>, transform_indices = @transform_1, window_bounds = array<i64: 16, 256>}, {pipeline_mode = #tpu.pipeline_mode<synchronous>, transform_indices = @transform_2, window_bounds = array<i64: 1, 256>}, {pipeline_mode = #tpu.pipeline_mode<synchronous>, transform_indices = @transform_3, window_bounds = array<i64: 256, 256>}, {pipeline_mode = #tpu.pipeline_mode<synchronous>, transform_indices = @transform_4, window_bounds = array<i64: 1, 256>}, {pipeline_mode = #tpu.pipeline_mode<synchronous>, transform_indices = @transform_5, window_bounds = array<i64: 256, 128>}, {pipeline_mode = #tpu.pipeline_mode<synchronous>, transform_indices = @transform_6, window_bounds = array<i64: 1, 128>}, {transform_indices = @transform_7, window_bounds = array<i64: 8, 128>}]} {
    %c0 = arith.constant 0 : index
    %c0_0 = arith.constant 0 : index
    %0 = vector.load %arg1[%c0, %c0_0] : memref<8x16xbf16, #tpu.memory_space<vmem>>, vector<8x16xbf16>
    %c0_1 = arith.constant 0 : index
    %c0_2 = arith.constant 0 : index
    %1 = vector.load %arg2[%c0_1, %c0_2] : memref<16x256xbf16, #tpu.memory_space<vmem>>, vector<16x256xbf16>
    %cst = arith.constant dense<0.000000e+00> : vector<8x256xf32>
    %2 = tpu.matmul %0, %1, %cst {dimension_numbers = #tpu.dot_dimension_numbers<[1], [0], [0], [1], [0, 0, 1, 1], [], []>} : vector<8x16xbf16>, vector<16x256xbf16>, vector<8x256xf32> -> vector<8x256xf32>
    %c0_3 = arith.constant 0 : index
    %c0_4 = arith.constant 0 : index
    %3 = vector.load %arg3[%c0_3, %c0_4] : memref<1x256xf32, #tpu.memory_space<vmem>>, vector<1x256xf32>
    %4 = vector.broadcast %3 : vector<1x256xf32> to vector<8x256xf32>
    %5 = arith.addf %2, %4 : vector<8x256xf32>
    %cst_5 = arith.constant 0.000000e+00 : f32
    %6 = vector.broadcast %cst_5 : f32 to vector<8x256xf32>
    %7 = arith.maximumf %5, %6 : vector<8x256xf32>
    %8 = arith.truncf %7 : vector<8x256xf32> to vector<8x256xbf16>
    %c0_6 = arith.constant 0 : index
    %c0_7 = arith.constant 0 : index
    %9 = vector.load %arg4[%c0_6, %c0_7] : memref<256x256xbf16, #tpu.memory_space<vmem>>, vector<256x256xbf16>
    %cst_8 = arith.constant dense<0.000000e+00> : vector<8x256xf32>
    %10 = tpu.matmul %8, %9, %cst_8 {dimension_numbers = #tpu.dot_dimension_numbers<[1], [0], [0], [1], [0, 0, 1, 1], [], []>} : vector<8x256xbf16>, vector<256x256xbf16>, vector<8x256xf32> -> vector<8x256xf32>
    %c0_9 = arith.constant 0 : index
    %c0_10 = arith.constant 0 : index
    %11 = vector.load %arg5[%c0_9, %c0_10] : memref<1x256xf32, #tpu.memory_space<vmem>>, vector<1x256xf32>
    %12 = vector.broadcast %11 : vector<1x256xf32> to vector<8x256xf32>
    %13 = arith.addf %10, %12 : vector<8x256xf32>
    %cst_11 = arith.constant 0.000000e+00 : f32
    %14 = vector.broadcast %cst_11 : f32 to vector<8x256xf32>
    %15 = arith.maximumf %13, %14 : vector<8x256xf32>
    %16 = arith.truncf %15 : vector<8x256xf32> to vector<8x256xbf16>
    %c0_12 = arith.constant 0 : index
    %c0_13 = arith.constant 0 : index
    %17 = vector.load %arg6[%c0_12, %c0_13] : memref<256x128xbf16, #tpu.memory_space<vmem>>, vector<256x128xbf16>
    %cst_14 = arith.constant dense<0.000000e+00> : vector<8x128xf32>
    %18 = tpu.matmul %16, %17, %cst_14 {dimension_numbers = #tpu.dot_dimension_numbers<[1], [0], [0], [1], [0, 0, 1, 1], [], []>} : vector<8x256xbf16>, vector<256x128xbf16>, vector<8x128xf32> -> vector<8x128xf32>
    %c0_15 = arith.constant 0 : index
    %c0_16 = arith.constant 0 : index
    %19 = vector.load %arg7[%c0_15, %c0_16] : memref<1x128xf32, #tpu.memory_space<vmem>>, vector<1x128xf32>
    %20 = vector.broadcast %19 : vector<1x128xf32> to vector<8x128xf32>
    %21 = arith.addf %18, %20 : vector<8x128xf32>
    %22 = math.tanh %21 : vector<8x128xf32>
    %cst_17 = arith.constant 2.000000e+00 : f32
    %23 = vector.broadcast %cst_17 : f32 to vector<8x128xf32>
    %24 = arith.mulf %23, %22 : vector<8x128xf32>
    %c0_18 = arith.constant 0 : index
    %c0_19 = arith.constant 0 : index
    %25 = vector.load %arg8[%c0_18, %c0_19] : memref<8x128xf32, #tpu.memory_space<vmem>>, vector<8x128xf32>
    tpu.vector_store %arg8[%c0_18, %c0_19], %24 {strides = array<i32>} : memref<8x128xf32, #tpu.memory_space<vmem>>, vector<8x128xf32>,
    return
  }
  func.func @transform_0(%arg0: i32) -> (i32, i32) {
    %c0_i32 = arith.constant 0 : i32
    %c0_i32_0 = arith.constant 0 : i32
    return %arg0, %c0_i32 : i32, i32
  }
  func.func @transform_1(%arg0: i32) -> (i32, i32) {
    %c0_i32 = arith.constant 0 : i32
    %c0_i32_0 = arith.constant 0 : i32
    %c0_i32_1 = arith.constant 0 : i32
    return %c0_i32, %c0_i32_0 : i32, i32
  }
  func.func @transform_2(%arg0: i32) -> (i32, i32) {
    %c0_i32 = arith.constant 0 : i32
    %c0_i32_0 = arith.constant 0 : i32
    %c0_i32_1 = arith.constant 0 : i32
    return %c0_i32, %c0_i32_0 : i32, i32
  }
  func.func @transform_3(%arg0: i32) -> (i32, i32) {
    %c0_i32 = arith.constant 0 : i32
    %c0_i32_0 = arith.constant 0 : i32
    %c0_i32_1 = arith.constant 0 : i32
    return %c0_i32, %c0_i32_0 : i32, i32
  }
  func.func @transform_4(%arg0: i32) -> (i32, i32) {
    %c0_i32 = arith.constant 0 : i32
    %c0_i32_0 = arith.constant 0 : i32
    %c0_i32_1 = arith.constant 0 : i32
    return %c0_i32, %c0_i32_0 : i32, i32
  }
  func.func @transform_5(%arg0: i32) -> (i32, i32) {
    %c0_i32 = arith.constant 0 : i32
    %c0_i32_0 = arith.constant 0 : i32
    %c0_i32_1 = arith.constant 0 : i32
    return %c0_i32, %c0_i32_0 : i32, i32
  }
  func.func @transform_6(%arg0: i32) -> (i32, i32) {
    %c0_i32 = arith.constant 0 : i32
    %c0_i32_0 = arith.constant 0 : i32
    %c0_i32_1 = arith.constant 0 : i32
    return %c0_i32, %c0_i32_0 : i32, i32
  }
  func.func @transform_7(%arg0: i32) -> (i32, i32) {
    %c0_i32 = arith.constant 0 : i32
    %c0_i32_0 = arith.constant 0 : i32
    return %arg0, %c0_i32 : i32, i32
  }
}

</mosaic_0001>

<bundles_post_ra>
// kernel: tpu_custom_call.1
= control target key start
LH: loop header
LB: loop body
LE: loop exit
PB: predicated region body
PF: predicated region fallthrough
CT: control target
= control target key end

     0   :  { %12 = vsyncpa [#allocation3], 0  ;;  %s995_s0 = inlined_call_operand.hbm [shape: bf16[8,16], index: 0, kind: input, shape index: {}]   ;;  %s996_s1 = inlined_call_operand.hbm [shape: bf16[16,256], index: 1, kind: input, shape index: {}]   ;;  %s997_s2 = inlined_call_operand.vmem [shape: f32[1,256], index: 2, kind: input, shape index: {}]   ;;  %s998_s3 = inlined_call_operand.hbm [shape: bf16[256,256], index: 3, kind: input, shape index: {}]   ;;  %s999_s4 = inlined_call_operand.vmem [shape: f32[1,256], index: 4, kind: input, shape index: {}]   ;;  %s1000_s5 = inlined_call_operand.hbm [shape: bf16[256,128], index: 5, kind: input, shape index: {}]   ;;  %s1001_s6 = inlined_call_operand.vmem [shape: f32[1,128], index: 6, kind: input, shape index: {}]   ;;  %s1002_s7 = inlined_call_operand.hbm [shape: f32[8,128], index: 7, kind: output, shape index: {}]  }
   0x1   :  { %13 = vsyncpa [#allocation6], 0 }
   0x2   :  { %14 = vsyncpa [#allocation9], 0 }
   0x3   :  { %15 = vsyncpa [#allocation4], 0  ;;  %s870_s24 = smov [#allocation5]   ;;  %s752_s28 = scalar_lea.hbm %s996_s1, 256 }
   0x4   :  { %s31_s25 = sshll.u32 %s870_s24, 4  ;;  %p753_p0 = scmp.ne.s32.totalorder %s996_s1, %s752_s28  ;;  %s32_s25 = int_to_ptr.vmem [resolvable:$true] %s31_s25 }
   0x5   :  { %p756_p1 = scmp.lt.u32.totalorder %s752_s28, %s996_s1 }
   0x7   :  { %p758_p2 = pnand %p756_p1, %p753_p0 }
   0x9   :  { %761 = shalt.err (!%p758_p2)
}
   0xa   :  { %s762_s10 = scalar_lea.vmem %s32_s25, 256  ;;  %p767_p4 = scmp.lt.s32.totalorder %s32_s25, %s32_s25 }
   0xb   :  { %p763_p3 = scmp.ne.s32.totalorder %s32_s25, %s762_s10  ;;  %p768_p5 = scmp.lt.s32.totalorder %s762_s10, %s762_s10 }
   0xd   :  { %p769_p6 = por %p768_p5, %p767_p4 }
   0xf   :  { %p770_p7 = pnand %p769_p6, %p763_p3 }
  0x11   :  { %773 = shalt.err (!%p770_p7)
}
  0x12   :  { %s871_s11 = smov 128   ;;  %s872_s12 = smov 8  }
  0x13   :  { %37 = dma.hbm_to_vmem [thread:$0]  %s996_s1, 256, %s32_s25, [#allocation6], %s871_s11, %s871_s11, %s872_s12  }
  0x14   :  { %s873_s15 = smov [#allocation2]   ;;  %s874_s17 = smov [#allocation7]  }
  0x15   :  { %s22_s16 = sshll.u32 %s873_s15, 4  ;;  %s45_s18 = sshll.u32 %s874_s17, 4  ;;  %s23_s16 = int_to_ptr.vmem [resolvable:$true] %s22_s16  ;;  %s46_s18 = int_to_ptr.vmem [resolvable:$true] %s45_s18 }
  0x16   :  { %s774_s21 = scalar_lea.hbm %s995_s0, 64 }
  0x17   :  { %p775_p8 = scmp.ne.s32.totalorder %s995_s0, %s774_s21  ;;  %p778_p9 = scmp.lt.u32.totalorder %s774_s21, %s995_s0 }
  0x19   :  { %p780_p10 = pnand %p778_p9, %p775_p8 }
  0x1b   :  { %783 = shalt.err (!%p780_p10)
}
  0x1c   :  { %s784_s1 = scalar_lea.vmem %s23_s16, 64  ;;  %p789_p12 = scmp.lt.s32.totalorder %s23_s16, %s23_s16 }
  0x1d   :  { %p785_p11 = scmp.ne.s32.totalorder %s23_s16, %s784_s1  ;;  %p790_p13 = scmp.lt.s32.totalorder %s784_s1, %s784_s1 }
  0x1f   :  { %p791_p0 = por %p790_p13, %p789_p12 }
  0x21   :  { %p792_p1 = pnand %p791_p0, %p785_p11 }
  0x23   :  { %795 = shalt.err (!%p792_p1)
}
  0x24   :  { %25 = dma.hbm_to_vmem [thread:$0]  %s995_s0, 64, %s23_s16, [#allocation3]  }
  0x25   :  { %s796_s30 = scalar_lea.hbm %s998_s3, 4096 }
  0x26   :  { %p797_p2 = scmp.ne.s32.totalorder %s998_s3, %s796_s30  ;;  %p800_p3 = scmp.lt.u32.totalorder %s796_s30, %s998_s3 }
  0x28   :  { %p802_p4 = pnand %p800_p3, %p797_p2 }
  0x2a   :  { %805 = shalt.err (!%p802_p4)
}
  0x2b   :  { %s806_s14 = scalar_lea.vmem %s46_s18, 4096  ;;  %p811_p6 = scmp.lt.s32.totalorder %s46_s18, %s46_s18 }
  0x2c   :  { %p807_p5 = scmp.ne.s32.totalorder %s46_s18, %s806_s14  ;;  %p812_p7 = scmp.lt.s32.totalorder %s806_s14, %s806_s14 }
  0x2e   :  { %p813_p8 = por %p812_p7, %p811_p6 }
  0x30   :  { %p814_p9 = pnand %p813_p8, %p807_p5 }
  0x32   :  { %817 = shalt.err (!%p814_p9)
}
  0x33   :  { %51 = dma.hbm_to_vmem [thread:$0]  %s998_s3, 4096, %s46_s18, [#allocation6], %s871_s11, %s871_s11, %s872_s12  }
  0x34   :  { %s875_s16 = smov [#allocation8]   ;;  %s818_s21 = scalar_lea.hbm %s1000_s5, 2048 }
  0x35   :  { %s59_s17 = sshll.u32 %s875_s16, 4  ;;  %p819_p10 = scmp.ne.s32.totalorder %s1000_s5, %s818_s21  ;;  %s60_s17 = int_to_ptr.vmem [resolvable:$true] %s59_s17 }
  0x36   :  { %p822_p11 = scmp.lt.u32.totalorder %s818_s21, %s1000_s5 }
  0x38   :  { %p824_p12 = pnand %p822_p11, %p819_p10 }
  0x3a   :  { %827 = shalt.err (!%p824_p12)
}
  0x3b   :  { %s828_s1 = scalar_lea.vmem %s60_s17, 2048  ;;  %p833_p0 = scmp.lt.s32.totalorder %s60_s17, %s60_s17 }
  0x3c   :  { %p829_p13 = scmp.ne.s32.totalorder %s60_s17, %s828_s1  ;;  %p834_p1 = scmp.lt.s32.totalorder %s828_s1, %s828_s1 }
  0x3e   :  { %p835_p2 = por %p834_p1, %p833_p0 }
  0x40   :  { %p836_p3 = pnand %p835_p2, %p829_p13 }
  0x42   :  { %839 = shalt.err (!%p836_p3)
}
  0x43   :  { %s876_s3 = smov 64   ;;  %s877_s11 = smov 4  }
  0x44   :  { %65 = dma.hbm_to_vmem [thread:$0]  %s1000_s5, 2048, %s60_s17, [#allocation9], %s876_s3, %s876_s3, %s877_s11  }
  0x45   :  { %862 = dma.done.wait [#allocation3], 64  }
  0x46   :  { %863 = vsyncadd [#allocation3], 4294967232 }
  0x47   :  { %864 = dma.done.wait [#allocation6], 4352  }
  0x48   :  { %865 = vsyncadd [#allocation6], 4294962944 }
  0x49   :  { %866 = dma.done.wait [#allocation9], 2048  }
  0x4a   :  { %867 = vsyncadd [#allocation9], 4294965248  ;;  %v878_v0 = vmov 0   ;;  %v683_v1 = vld [vmem:[#allocation5 + $0x4] ss:$8 sps:$4 sm:$0xff]   ;;  %vm106_vm0 = vcmask 130048   ;;  %v86_v48 = vlaneseq }
  0x4b   :  { %142 = vmatprep.mubr.bf16.mxu0 %v878_v0  ;;  %v685_v2 = vld [vmem:[#allocation5] ss:$8 sps:$4 sm:$0xff]   ;;  %v81_v3 = vld [vmem:[#allocation2] sm:$0xf]  ;;  %110 = vmatprep.subr.bf16.mxu0 %v683_v1  ;;  %v688_v5 = vld [vmem:[#allocation7] ss:$8 sps:$4 sm:$0xff]  }
  0x4c   :  { %v686_v4 = vld [vmem:[#allocation7 + $0x4] ss:$8 sps:$4 sm:$0xff]   ;;  %111 = vmatpush1.bf16.msra.mxu0 %v685_v2  ;;  %v689_v6 = vld [vmem:[#allocation7 + $0x14] ss:$8 sps:$4 sm:$0xff]   ;;  %v691_v7 = vld [vmem:[#allocation7 + $0x10] ss:$8 sps:$4 sm:$0xff]  }
  0x4d   :  { %359 = vmatprep.subr.bf16.mxu1 %v686_v4  ;;  %v692_v8 = vld [vmem:[#allocation7 + $0x24] ss:$8 sps:$4 sm:$0xff]   ;;  %v694_v9 = vld [vmem:[#allocation7 + $0x20] ss:$8 sps:$4 sm:$0xff]   ;;  %v695_v10 = vld [vmem:[#allocation7 + $0x34] ss:$8 sps:$4 sm:$0xff]  }
  0x4e   :  { %360 = vmatpush1.bf16.msra.mxu1 %v688_v5  ;;  %v697_v11 = vld [vmem:[#allocation7 + $0x30] ss:$8 sps:$4 sm:$0xff]   ;;  %v698_v12 = vld [vmem:[#allocation7 + $0x44] ss:$8 sps:$4 sm:$0xff]   ;;  %v700_v13 = vld [vmem:[#allocation7 + $0x40] ss:$8 sps:$4 sm:$0xff]  }
  0x4f   :  { %601 = vmatmul.mubr.msk.bf16.vlgmr.msra.gmra.mrb[0].mxu0 %vm106_vm0, %v81_v3  ;;  %361 = vmatprep.subr.bf16.mxu1 %v689_v6  ;;  %v701_v14 = vld [vmem:[#allocation7 + $0x54] ss:$8 sps:$4 sm:$0xff]   ;;  %v703_v15 = vld [vmem:[#allocation7 + $0x50] ss:$8 sps:$4 sm:$0xff]   ;;  %v704_v16 = vld [vmem:[#allocation7 + $0x64] ss:$8 sps:$4 sm:$0xff]  }
  0x50   :  { %v706_v17 = vld [vmem:[#allocation7 + $0x60] ss:$8 sps:$4 sm:$0xff]   ;;  %v707_v18 = vld [vmem:[#allocation7 + $0x74] ss:$8 sps:$4 sm:$0xff]   ;;  %v709_v19 = vld [vmem:[#allocation7 + $0x70] ss:$8 sps:$4 sm:$0xff]  }
  0x51   :  { %v710_v20 = vld [vmem:[#allocation7 + $0x84] ss:$8 sps:$4 sm:$0xff]   ;;  %v712_v21 = vld [vmem:[#allocation7 + $0x80] ss:$8 sps:$4 sm:$0xff]   ;;  %v713_v22 = vld [vmem:[#allocation7 + $0x94] ss:$8 sps:$4 sm:$0xff]  }
  0x52   :  { %362 = vmatpush1.bf16.msra.mxu1 %v691_v7  ;;  %v715_v23 = vld [vmem:[#allocation7 + $0x90] ss:$8 sps:$4 sm:$0xff]   ;;  %v716_v24 = vld [vmem:[#allocation7 + $0xa4] ss:$8 sps:$4 sm:$0xff]   ;;  %v718_v25 = vld [vmem:[#allocation7 + $0xa0] ss:$8 sps:$4 sm:$0xff]  }
  0x53   :  { %363 = vmatprep.subr.bf16.mxu1 %v692_v8  ;;  %v719_v26 = vld [vmem:[#allocation7 + $0xb4] ss:$8 sps:$4 sm:$0xff]   ;;  %v721_v27 = vld [vmem:[#allocation7 + $0xb0] ss:$8 sps:$4 sm:$0xff]   ;;  %v722_v28 = vld [vmem:[#allocation7 + $0xc4] ss:$8 sps:$4 sm:$0xff]  }
  0x54   :  { %v724_v29 = vld [vmem:[#allocation7 + $0xc0] ss:$8 sps:$4 sm:$0xff]   ;;  %v725_v30 = vld [vmem:[#allocation7 + $0xd4] ss:$8 sps:$4 sm:$0xff]   ;;  %v727_v31 = vld [vmem:[#allocation7 + $0xd0] ss:$8 sps:$4 sm:$0xff]  }
  0x55   :  { %v728_v32 = vld [vmem:[#allocation7 + $0xe4] ss:$8 sps:$4 sm:$0xff]   ;;  %v730_v33 = vld [vmem:[#allocation7 + $0xe0] ss:$8 sps:$4 sm:$0xff]   ;;  %v731_v34 = vld [vmem:[#allocation7 + $0xf4] ss:$8 sps:$4 sm:$0xff]  }
  0x56   :  { %364 = vmatpush1.bf16.msra.mxu1 %v694_v9  ;;  %v733_v35 = vld [vmem:[#allocation7 + $0xf0] ss:$8 sps:$4 sm:$0xff]   ;;  %v734_v36 = vld [vmem:[#allocation8 + $0x40] sm:$0xff]   ;;  %v736_v38 = vld [vmem:[#allocation8 + $0x48] sm:$0xff]   ;;  %v87_v49 = vshrl.u32 %v86_v48, 7 }
  0x57   :  { %365 = vmatprep.subr.bf16.mxu1 %v695_v10  ;;  %v735_v37 = vld [vmem:[#allocation8] sm:$0xff]   ;;  %651 = vmatprep.subr.bf16.mxu0 %v734_v36  ;;  %v737_v39 = vld [vmem:[#allocation8 + $0x8] sm:$0xff]   ;;  %v738_v40 = vld [vmem:[#allocation8 + $0x50] sm:$0xff]  }
  0x58   :  { %652 = vmatpush3.bf16.msra.mxu0 %v735_v37  ;;  %v739_v41 = vld [vmem:[#allocation8 + $0x10] sm:$0xff]   ;;  %v740_v42 = vld [vmem:[#allocation8 + $0x58] sm:$0xff]   ;;  %v742_v44 = vld [vmem:[#allocation8 + $0x60] sm:$0xff]   ;;  %v88_v50 = vsub.s32 0, %v87_v49  ;;  %v92_v52 = vsub.s32 1, %v87_v49 }
  0x59   :  { %653 = vmatprep.subr.bf16.mxu0 %v736_v38  ;;  %v741_v43 = vld [vmem:[#allocation8 + $0x18] sm:$0xff]   ;;  %v743_v45 = vld [vmem:[#allocation8 + $0x20] sm:$0xff]   ;;  %v744_v46 = vld [vmem:[#allocation8 + $0x68] sm:$0xff]  }
  0x5a   :  { %366 = vmatpush1.bf16.msra.mxu1 %v697_v11  ;;  %v745_v47 = vld [vmem:[#allocation8 + $0x28] sm:$0xff]   ;;  %v746_v1 = vld [vmem:[#allocation8 + $0x70] sm:$0xff]   ;;  %v748_v3 = vld [vmem:[#allocation8 + $0x78] sm:$0xff]  }
  0x5b   :  { %367 = vmatprep.subr.bf16.mxu1 %v698_v12  ;;  %v84_v51 = vld [vmem:[%s997_s2] sm:$0x3]  ;;  %v747_v2 = vld [vmem:[#allocation8 + $0x30] sm:$0xff]   ;;  %v749_v4 = vld [vmem:[#allocation8 + $0x38] sm:$0xff]  }
  0x5c   :  { %654 = vmatpush3.bf16.msra.mxu0 %v737_v39  ;;  %v89_v53 = vrot.slane %v84_v51, %v88_v50  ;;  %v93_v54 = vrot.slane %v84_v51, %v92_v52  ;;  %v187_v5 = vld [vmem:[%s999_s4] sm:$0x3]  ;;  %s879_s4 = smov [#allocation10]  }
  0x5d   :  { %655 = vmatprep.subr.bf16.mxu0 %v738_v40  ;;  %v192_v6 = vrot.slane %v187_v5, %v88_v50  ;;  %v196_v7 = vrot.slane %v187_v5, %v92_v52  ;;  %s588_s30 = sshll.u32 %s879_s4, 4  ;;  %s589_s30 = int_to_ptr.vmem [resolvable:$true] %s588_s30 }
  0x5e   :  { %368 = vmatpush1.bf16.msra.mxu1 %v700_v13  ;;  %s840_s8 = scalar_lea.vmem %s589_s30, 128  ;;  %p845_p5 = scmp.lt.s32.totalorder %s589_s30, %s589_s30 }
  0x5f   :  { %369 = vmatprep.subr.bf16.mxu1 %v701_v14  ;;  %p841_p4 = scmp.ne.s32.totalorder %s589_s30, %s840_s8  ;;  %p846_p6 = scmp.lt.s32.totalorder %s840_s8, %s840_s8 }
  0x60   :  { %656 = vmatpush3.bf16.msra.mxu0 %v739_v41 }
  0x61   :  { %657 = vmatprep.subr.bf16.mxu0 %v740_v42  ;;  %p847_p7 = por %p846_p6, %p845_p5 }
  0x62   :  { %370 = vmatpush1.bf16.msra.mxu1 %v703_v15 }
  0x63   :  { %371 = vmatprep.subr.bf16.mxu1 %v704_v16  ;;  %p848_p8 = pnand %p847_p7, %p841_p4 }
  0x64   :  { %658 = vmatpush3.bf16.msra.mxu0 %v741_v43 }
  0x65   :  { %659 = vmatprep.subr.bf16.mxu0 %v742_v44 }
  0x66   :  { %372 = vmatpush1.bf16.msra.mxu1 %v706_v17 }
  0x67   :  { %373 = vmatprep.subr.bf16.mxu1 %v707_v18 }
  0x68   :  { %660 = vmatpush3.bf16.msra.mxu0 %v743_v45 }
  0x69   :  { %661 = vmatprep.subr.bf16.mxu0 %v744_v46 }
  0x6a   :  { %374 = vmatpush1.bf16.msra.mxu1 %v709_v19  ;;  %v634_v19 = vld [vmem:[%s1001_s6] ss:$0 sm:$0xff] }
  0x6b   :  { %375 = vmatprep.subr.bf16.mxu1 %v710_v20 }
  0x6c   :  { %662 = vmatpush3.bf16.msra.mxu0 %v745_v47 }
  0x6d   :  { %663 = vmatprep.subr.bf16.mxu0 %v746_v1 }
  0x6e   :  { %376 = vmatpush1.bf16.msra.mxu1 %v712_v21 }
  0x6f   :  { %377 = vmatprep.subr.bf16.mxu1 %v713_v22 }
  0x70   :  { %664 = vmatpush3.bf16.msra.mxu0 %v747_v2 }
  0x71   :  { %665 = vmatprep.subr.bf16.mxu0 %v748_v3 }
  0x72   :  { %378 = vmatpush1.bf16.msra.mxu1 %v715_v23 }
  0x73   :  { %379 = vmatprep.subr.bf16.mxu1 %v716_v24 }
  0x74   :  { %666 = vmatpush3.bf16.msra.mxu0 %v749_v4 }
  0x76   :  { %380 = vmatpush1.bf16.msra.mxu1 %v718_v25 }
  0x77   :  { %381 = vmatprep.subr.bf16.mxu1 %v719_v26 }
  0x7a   :  { %382 = vmatpush1.bf16.msra.mxu1 %v721_v27 }
  0x7b   :  { %383 = vmatprep.subr.bf16.mxu1 %v722_v28 }
  0x7e   :  { %384 = vmatpush1.bf16.msra.mxu1 %v724_v29 }
  0x7f   :  { %385 = vmatprep.subr.bf16.mxu1 %v725_v30 }
  0x82   :  { %386 = vmatpush1.bf16.msra.mxu1 %v727_v31 }
  0x83   :  { %387 = vmatprep.subr.bf16.mxu1 %v728_v32 }
  0x86   :  { %388 = vmatpush1.bf16.msra.mxu1 %v730_v33 }
  0x87   :  { %389 = vmatprep.subr.bf16.mxu1 %v731_v34 }
  0x8a   :  { %390 = vmatpush1.bf16.msra.mxu1 %v733_v35 }
 0x122   :  { %v144_v55 = vpop.f32.mrb[0].mxu0 }
 0x123   :  { %v145_v56 = vadd.f32 %v144_v55, %v89_v53  ;;  %v146_v57 = vpop.f32.mrb[1].mxu0 }
 0x124   :  { %v147_v58 = vadd.f32 %v146_v57, %v93_v54  ;;  %v148_v59 = vpop.f32.mrb[2].mxu0 }
 0x125   :  { %v151_v60 = vmax.f32 %v145_v56, 0.0  ;;  %v149_v61 = vpop.f32.mrb[3].mxu0 }
 0x126   :  { %v152_v62 = vmax.f32 %v147_v58, 0.0 }
 0x127   :  { %v153_v0 = vpack.c.bf16 %v151_v60, %v151_v60 }
 0x128   :  { %v154_v63 = vpack.c.bf16 %v152_v62, %v152_v62 }
 0x12a   :  { %391 = vmatprep.mubr.bf16.mxu1 %v154_v63 }
 0x12b   :  { %392 = vmatmul.mubr.bf16.vlgmr.msra.gmra.mrb[0].mxu1 %v153_v0 }
 0x1fe   :  { %v393_v8 = vpop.f32.mrb[0].mxu1 }
 0x1ff   :  { %v394_v9 = vadd.f32 %v393_v8, %v192_v6  ;;  %v395_v10 = vpop.f32.mrb[1].mxu1 }
 0x200   :  { %v396_v11 = vadd.f32 %v395_v10, %v196_v7  ;;  %v397_v12 = vpop.f32.mrb[2].mxu1 }
 0x201   :  { %v400_v13 = vmax.f32 %v394_v9, 0.0  ;;  %v398_v14 = vpop.f32.mrb[3].mxu1 }
 0x202   :  { %v401_v15 = vmax.f32 %v396_v11, 0.0 }
 0x203   :  { %v402_v17 = vpack.c.bf16 %v400_v13, %v400_v13 }
 0x204   :  { %v403_v16 = vpack.c.bf16 %v401_v15, %v401_v15 }
 0x206   :  { %571 = vmatprep.mubr.bf16.mxu0 %v403_v16 }
 0x207   :  { %572 = vmatmul.mubr.bf16.vlgmr.msra.gmra.mrb[4].mxu0 %v402_v17 }
 0x2da   :  { %v667_v18 = vpop.f32.mrb[4].mxu0 }
 0x2db   :  { %v668_v20 = vpop.f32.mrb[5].mxu0 }
 0x2dc   :  { %v669_v21 = vadd.f32 %v668_v20, %v667_v18  ;;  %v670_v22 = vpop.f32.mrb[6].mxu0 }
 0x2dd   :  { %v671_v23 = vpop.f32.mrb[7].mxu0 }
 0x2de   :  { %v574_v24 = vadd.f32 %v669_v21, %v634_v19 }
 0x2e0   :  { %750 = vtanh.f32 %v574_v24 }
 0x2ea   :  { %v751_v25 = vpop.eup %750 }
 0x2eb   :  { %v580_v26 = vmul.f32 2.0, %v751_v25 }
 0x2ed   :  { %581 = vst [vmem:[#allocation10] sm:$0xff] %v580_v26 }
 0x2ee   :  { %851 = shalt.err (!%p848_p8)
}
 0x2ef   :  { %s852_s10 = scalar_lea.hbm %s1002_s7, 128 }
 0x2f0   :  { %p853_p9 = scmp.ne.s32.totalorder %s1002_s7, %s852_s10  ;;  %p856_p10 = scmp.lt.u32.totalorder %s852_s10, %s1002_s7 }
 0x2f2   :  { %p858_p11 = pnand %p856_p10, %p853_p9 }
 0x2f4   :  { %861 = shalt.err (!%p858_p11)
}
 0x2f5   :  { %591 = dma.vmem_to_hbm [thread:$0]  %s589_s30, 128, %s1002_s7, [#allocation4]  }
 0x2f6   :  { %868 = dma.done.wait [#allocation4], 128  }
 0x2f7   :  { %869 = vsyncadd [#allocation4], 4294967168 }
 0x2f8   :  { %595 = vsyncpa [#allocation3], 1 }
 0x2f9   :  { %596 = vsyncpa [#allocation6], 1 }
 0x2fa   :  { %597 = vsyncpa [#allocation9], 1 }
 0x2fb   :  { %598 = vsyncpa [#allocation4], 1 }

</bundles_post_ra>
